<compile_context>
chip_gen: v6e
topology: v6e:2x2x1
jax: 0.10.0
libtpu: 0.0.40
codegen_flags: <defaults>
</compile_context>

<pallas_src>
import functools

import jax
import jax.numpy as jnp
from jax.experimental import pallas as pl
from jax.experimental.pallas import tpu as pltpu


def _round_up(v: int, m: int) -> int:
    return (v + m - 1) // m * m


def _encoder_kernel(x_ref, w1_ref, b1_ref, wh_ref, bh_ref, out_ref, acc_ref):
    """Grid = (batch tiles, K tiles over n_input)."""
    k = pl.program_id(1)

    @pl.when(k == 0)
    def _init():
        acc_ref[...] = jnp.zeros_like(acc_ref)

    # Hidden-layer partial product on the MXU, f32 accumulation.
    acc_ref[...] += jnp.dot(x_ref[...], w1_ref[...],
                            preferred_element_type=jnp.float32)

    @pl.when(k == pl.num_programs(1) - 1)
    def _finalize():
        # Bias + LeakyReLU (slope 0.01, PyTorch default) in f32 on the VPU.
        h = acc_ref[...] + b1_ref[...]
        q = jnp.where(h > 0, h, 0.01 * h)
        # Fused mean/var heads: one lane-dense matmul + one unmasked store.
        q = q.astype(wh_ref.dtype)
        out = jnp.dot(q, wh_ref[...], preferred_element_type=jnp.float32) + bh_ref[...]
        out_ref[...] = out.astype(out_ref.dtype)


@functools.partial(jax.jit, static_argnames=("compute_dtype", "tm", "tk"))
def encoder_forward(x, w1, b1, wm, bm, wv, bv, *,
                    compute_dtype=jnp.bfloat16, tm=512, tk=512):
    """x: (B, n_input); w1: (n_input, n_hidden); wm/wv: (n_hidden, n_output).

    Weights are stored pre-transposed relative to PyTorch ((in, out)); biases as
    (1, n_out). Returns (mu, var), both f32 of shape (B, n_output).
    """
    B, n_input = x.shape
    n_hidden = w1.shape[1]
    n_output = wm.shape[1]

    itemsize = jnp.dtype(compute_dtype).itemsize
    row_align = 8 if itemsize == 4 else 16        # bf16 sublane packing

    # ---- Padded, lane-dense problem sizes -------------------------------------
    n_hidden_p = _round_up(n_hidden, 128)
    n_out_p = _round_up(2 * n_output, 128)        # fused mu|var heads, >=128 lanes
    tk_eff = min(tk, _round_up(n_input, 128))
    n_in_p = _round_up(n_input, tk_eff)
    tm_eff = min(tm, _round_up(B, row_align))
    b_p = _round_up(B, tm_eff)

    def pad2(a, rows, cols, dtype):
        buf = jnp.zeros((rows, cols), dtype=dtype)
        return buf.at[:a.shape[0], :a.shape[1]].set(a.astype(dtype))

    # MXU operands in compute_dtype; biases stay f32 (VPU math stays f32).
    x_p = pad2(x, b_p, n_in_p, compute_dtype)
    w1_p = pad2(w1, n_in_p, n_hidden_p, compute_dtype)
    b1_p = pad2(b1, 1, n_hidden_p, jnp.float32)
    wh = jnp.concatenate([wm, wv], axis=1)        # (n_hidden, 2*n_output)
    bh = jnp.concatenate([bm, bv], axis=1)        # (1, 2*n_output)
    wh_p = pad2(wh, n_hidden_p, n_out_p, compute_dtype)
    bh_p = pad2(bh, 1, n_out_p, jnp.float32)

    grid = (b_p // tm_eff, n_in_p // tk_eff)

    # ---- VMEM budget (double-buffered tiles + resident weights + accumulator) --
    est = (2 * tm_eff * tk_eff * itemsize
           + 2 * tk_eff * n_hidden_p * itemsize
           + n_hidden_p * 4
           + n_hidden_p * n_out_p * itemsize
           + n_out_p * 4
           + 2 * tm_eff * n_out_p * 4
           + tm_eff * n_hidden_p * 4)
    vmem_limit = int(min(max(2 * est, 32 * 1024 * 1024), 64 * 1024 * 1024))

    cost = pl.CostEstimate(
        flops=2 * b_p * n_in_p * n_hidden_p + 2 * b_p * n_hidden_p * n_out_p,
        transcendentals=0,
        bytes_accessed=(x_p.size * itemsize + w1_p.size * itemsize
                        + wh_p.size * itemsize + b1_p.size * 4 + bh_p.size * 4
                        + b_p * n_out_p * 4),
    )

    out = pl.pallas_call(
        _encoder_kernel,
        out_shape=jax.ShapeDtypeStruct((b_p, n_out_p), jnp.float32),
        grid=grid,
        in_specs=[
            pl.BlockSpec((tm_eff, tk_eff), lambda i, k: (i, k)),        # x tile
            pl.BlockSpec((tk_eff, n_hidden_p), lambda i, k: (k, 0)),    # W1 tile
            pl.BlockSpec((1, n_hidden_p), lambda i, k: (0, 0)),         # b1 (resident)
            pl.BlockSpec((n_hidden_p, n_out_p), lambda i, k: (0, 0)),   # fused heads (resident)
            pl.BlockSpec((1, n_out_p), lambda i, k: (0, 0)),            # fused bias (resident)
        ],
        out_specs=pl.BlockSpec((tm_eff, n_out_p), lambda i, k: (i, 0)),
        scratch_shapes=[pltpu.VMEM((tm_eff, n_hidden_p), jnp.float32)],
        compiler_params=pltpu.CompilerParams(
            dimension_semantics=("parallel", "arbitrary"),
            vmem_limit_bytes=vmem_limit,
        ),
        cost_estimate=cost,
    )(x_p, w1_p, b1_p, wh_p, bh_p)

    mu = out[:B, :n_output]
    var = out[:B, n_output:2 * n_output]
    return mu, var


def _ref_forward(x, w1, b1, wm, bm, wv, bv, compute_dtype=jnp.float32):
    """Pure-JAX reference mirroring the kernel's cast/accumulation choices."""
    cd = compute_dtype
    h = jnp.dot(x.astype(cd), w1.astype(cd),
                preferred_element_type=jnp.float32) + b1
    q = jnp.where(h > 0, h, 0.01 * h)
    q = q.astype(cd)
    mu = jnp.dot(q, wm.astype(cd), preferred_element_type=jnp.float32) + bm
    var = jnp.dot(q, wv.astype(cd), preferred_element_type=jnp.float32) + bv
    return mu, var


if __name__ == "__main__":
    # Small shapes implied by the module: Encoder(n_input, n_output, n_hidden).
    B, n_input, n_hidden, n_output = 8, 32, 128, 16

    key = jax.random.PRNGKey(0)
    k = jax.random.split(key, 7)

    x = jax.random.normal(k[0], (B, n_input), dtype=jnp.float32)
    w1 = jax.random.normal(k[1], (n_input, n_hidden), dtype=jnp.float32) * 0.1
    b1 = jax.random.normal(k[2], (1, n_hidden), dtype=jnp.float32) * 0.1
    wm = jax.random.normal(k[3], (n_hidden, n_output), dtype=jnp.float32) * 0.1
    bm = jax.random.normal(k[4], (1, n_output), dtype=jnp.float32) * 0.1
    wv = jax.random.normal(k[5], (n_hidden, n_output), dtype=jnp.float32) * 0.1
    bv = jax.random.normal(k[6], (1, n_output), dtype=jnp.float32) * 0.1

    # Strict-numerics f32 path.
    mu32, var32 = jax.block_until_ready(
        encoder_forward(x, w1, b1, wm, bm, wv, bv, compute_dtype=jnp.float32))
    mu_r32, var_r32 = _ref_forward(x, w1, b1, wm, bm, wv, bv, jnp.float32)
    assert mu32.shape == (B, n_output) and var32.shape == (B, n_output)
    assert jnp.allclose(mu32, mu_r32, atol=1e-4, rtol=1e-4)
    assert jnp.allclose(var32, var_r32, atol=1e-4, rtol=1e-4)

    # Default bf16-MXU / f32-accumulate path (perf configuration).
    mu16, var16 = jax.block_until_ready(
        encoder_forward(x, w1, b1, wm, bm, wv, bv, compute_dtype=jnp.bfloat16))
    mu_r16, var_r16 = _ref_forward(x, w1, b1, wm, bm, wv, bv, jnp.bfloat16)
    assert mu16.shape == (B, n_output) and var16.shape == (B, n_output)
    assert jnp.allclose(mu16, mu_r16, atol=1e-2, rtol=1e-2)
    assert jnp.allclose(var16, var_r16, atol=1e-2, rtol=1e-2)

    print("KERNEL_OK")
</pallas_src>

<mosaic_0001>
module attributes {stable_mosaic.version = 11 : i64} {
  func.func @_encoder_kernel(%arg0: i32, %arg1: i32, %arg2: memref<8x128xf32, #tpu.memory_space<vmem>>, %arg3: memref<128x128xf32, #tpu.memory_space<vmem>>, %arg4: memref<1x128xf32, #tpu.memory_space<vmem>>, %arg5: memref<128x128xf32, #tpu.memory_space<vmem>>, %arg6: memref<1x128xf32, #tpu.memory_space<vmem>>, %arg7: memref<8x128xf32, #tpu.memory_space<vmem>>, %arg8: memref<8x128xf32, #tpu.memory_space<vmem>>) attributes {dimension_semantics = [#tpu.dimension_semantics<parallel>, #tpu.dimension_semantics<arbitrary>], iteration_bounds = array<i64: 1, 1>, scalar_prefetch = 0 : i64, scratch_operands = 1 : i64, tpu.core_type = #tpu.core_type<tc>, window_params = [{transform_indices = @transform_0, window_bounds = array<i64: 8, 128>}, {transform_indices = @transform_1, window_bounds = array<i64: 128, 128>}, {pipeline_mode = #tpu.pipeline_mode<synchronous>, transform_indices = @transform_2, window_bounds = array<i64: 1, 128>}, {pipeline_mode = #tpu.pipeline_mode<synchronous>, transform_indices = @transform_3, window_bounds = array<i64: 128, 128>}, {pipeline_mode = #tpu.pipeline_mode<synchronous>, transform_indices = @transform_4, window_bounds = array<i64: 1, 128>}, {transform_indices = @transform_5, window_bounds = array<i64: 8, 128>}]} {
    %c0_i32 = arith.constant 0 : i32
    %0 = arith.cmpi eq, %arg1, %c0_i32 : i32
    %1 = arith.extui %0 : i1 to i32
    %c0_i32_0 = arith.constant 0 : i32
    %2 = arith.cmpi ne, %1, %c0_i32_0 : i32
    scf.if %2 {
      %cst_10 = arith.constant 0.000000e+00 : f32
      %12 = vector.broadcast %cst_10 : f32 to vector<8x128xf32>
      %c0_11 = arith.constant 0 : index
      %c0_12 = arith.constant 0 : index
      %13 = vector.load %arg8[%c0_11, %c0_12] : memref<8x128xf32, #tpu.memory_space<vmem>>, vector<8x128xf32>
      tpu.vector_store %arg8[%c0_11, %c0_12], %12 {strides = array<i32>} : memref<8x128xf32, #tpu.memory_space<vmem>>, vector<8x128xf32>,
    } else {
    }
    %c0 = arith.constant 0 : index
    %c0_1 = arith.constant 0 : index
    %3 = vector.load %arg8[%c0, %c0_1] : memref<8x128xf32, #tpu.memory_space<vmem>>, vector<8x128xf32>
    %c0_2 = arith.constant 0 : index
    %c0_3 = arith.constant 0 : index
    %4 = vector.load %arg2[%c0_2, %c0_3] : memref<8x128xf32, #tpu.memory_space<vmem>>, vector<8x128xf32>
    %c0_4 = arith.constant 0 : index
    %c0_5 = arith.constant 0 : index
    %5 = vector.load %arg3[%c0_4, %c0_5] : memref<128x128xf32, #tpu.memory_space<vmem>>, vector<128x128xf32>
    %cst = arith.constant dense<0.000000e+00> : vector<8x128xf32>
    %6 = tpu.matmul %4, %5, %cst {dimension_numbers = #tpu.dot_dimension_numbers<[1], [0], [0], [1], [0, 0, 1, 1], [], []>} : vector<8x128xf32>, vector<128x128xf32>, vector<8x128xf32> -> vector<8x128xf32>
    %7 = arith.addf %3, %6 : vector<8x128xf32>
    %c0_6 = arith.constant 0 : index
    %c0_7 = arith.constant 0 : index
    %8 = vector.load %arg8[%c0_6, %c0_7] : memref<8x128xf32, #tpu.memory_space<vmem>>, vector<8x128xf32>
    tpu.vector_store %arg8[%c0_6, %c0_7], %7 {strides = array<i32>} : memref<8x128xf32, #tpu.memory_space<vmem>>, vector<8x128xf32>,
    %c0_i32_8 = arith.constant 0 : i32
    %9 = arith.cmpi eq, %arg1, %c0_i32_8 : i32
    %10 = arith.extui %9 : i1 to i32
    %c0_i32_9 = arith.constant 0 : i32
    %11 = arith.cmpi ne, %10, %c0_i32_9 : i32
    scf.if %11 {
      %c0_10 = arith.constant 0 : index
      %c0_11 = arith.constant 0 : index
      %12 = vector.load %arg8[%c0_10, %c0_11] : memref<8x128xf32, #tpu.memory_space<vmem>>, vector<8x128xf32>
      %c0_12 = arith.constant 0 : index
      %c0_13 = arith.constant 0 : index
      %13 = vector.load %arg4[%c0_12, %c0_13] : memref<1x128xf32, #tpu.memory_space<vmem>>, vector<1x128xf32>
      %14 = vector.broadcast %13 : vector<1x128xf32> to vector<8x128xf32>
      %15 = arith.addf %12, %14 : vector<8x128xf32>
      %cst_14 = arith.constant 0.000000e+00 : f32
      %16 = vector.broadcast %cst_14 : f32 to vector<8x128xf32>
      %17 = arith.cmpf ogt, %15, %16 : vector<8x128xf32>
      %cst_15 = arith.constant 0.00999999977 : f32
      %18 = vector.broadcast %cst_15 : f32 to vector<8x128xf32>
      %19 = arith.mulf %18, %15 : vector<8x128xf32>
      %20 = arith.select %17, %15, %19 : vector<8x128xi1>, vector<8x128xf32>
      %c0_16 = arith.constant 0 : index
      %c0_17 = arith.constant 0 : index
      %21 = vector.load %arg5[%c0_16, %c0_17] : memref<128x128xf32, #tpu.memory_space<vmem>>, vector<128x128xf32>
      %cst_18 = arith.constant dense<0.000000e+00> : vector<8x128xf32>
      %22 = tpu.matmul %20, %21, %cst_18 {dimension_numbers = #tpu.dot_dimension_numbers<[1], [0], [0], [1], [0, 0, 1, 1], [], []>} : vector<8x128xf32>, vector<128x128xf32>, vector<8x128xf32> -> vector<8x128xf32>
      %c0_19 = arith.constant 0 : index
      %c0_20 = arith.constant 0 : index
      %23 = vector.load %arg6[%c0_19, %c0_20] : memref<1x128xf32, #tpu.memory_space<vmem>>, vector<1x128xf32>
      %24 = vector.broadcast %23 : vector<1x128xf32> to vector<8x128xf32>
      %25 = arith.addf %22, %24 : vector<8x128xf32>
      %c0_21 = arith.constant 0 : index
      %c0_22 = arith.constant 0 : index
      %26 = vector.load %arg7[%c0_21, %c0_22] : memref<8x128xf32, #tpu.memory_space<vmem>>, vector<8x128xf32>
      tpu.vector_store %arg7[%c0_21, %c0_22], %25 {strides = array<i32>} : memref<8x128xf32, #tpu.memory_space<vmem>>, vector<8x128xf32>,
    } else {
    }
    return
  }
  func.func @transform_0(%arg0: i32, %arg1: i32) -> (i32, i32) {
    %c0_i32 = arith.constant 0 : i32
    return %arg0, %arg1 : i32, i32
  }
  func.func @transform_1(%arg0: i32, %arg1: i32) -> (i32, i32) {
    %c0_i32 = arith.constant 0 : i32
    %c0_i32_0 = arith.constant 0 : i32
    return %arg1, %c0_i32 : i32, i32
  }
  func.func @transform_2(%arg0: i32, %arg1: i32) -> (i32, i32) {
    %c0_i32 = arith.constant 0 : i32
    %c0_i32_0 = arith.constant 0 : i32
    %c0_i32_1 = arith.constant 0 : i32
    return %c0_i32, %c0_i32_0 : i32, i32
  }
  func.func @transform_3(%arg0: i32, %arg1: i32) -> (i32, i32) {
    %c0_i32 = arith.constant 0 : i32
    %c0_i32_0 = arith.constant 0 : i32
    %c0_i32_1 = arith.constant 0 : i32
    return %c0_i32, %c0_i32_0 : i32, i32
  }
  func.func @transform_4(%arg0: i32, %arg1: i32) -> (i32, i32) {
    %c0_i32 = arith.constant 0 : i32
    %c0_i32_0 = arith.constant 0 : i32
    %c0_i32_1 = arith.constant 0 : i32
    return %c0_i32, %c0_i32_0 : i32, i32
  }
  func.func @transform_5(%arg0: i32, %arg1: i32) -> (i32, i32) {
    %c0_i32 = arith.constant 0 : i32
    %c0_i32_0 = arith.constant 0 : i32
    return %arg0, %c0_i32 : i32, i32
  }
}

</mosaic_0001>

<bundles_post_ra>
// kernel: encoder_forward.1
= control target key start
LH: loop header
LB: loop body
LE: loop exit
PB: predicated region body
PF: predicated region fallthrough
CT: control target
= control target key end

     0   :  { %v336_v0 = vmov 0.0   ;;  %vm337_vm0 = vmmov 0   ;;  %s510_s1 = inlined_call_operand.vmem [shape: f32[128,128], index: 1, kind: input, shape index: {}]   ;;  %s511_s3 = inlined_call_operand.vmem [shape: f32[128,128], index: 3, kind: input, shape index: {}]   ;;  %s512_s0 = inlined_call_operand.vmem [shape: f32[8,128], index: 0, kind: input, shape index: {}]   ;;  %s513_s2 = inlined_call_operand.vmem [shape: f32[1,128], index: 2, kind: input, shape index: {}]   ;;  %s514_s4 = inlined_call_operand.vmem [shape: f32[1,128], index: 4, kind: input, shape index: {}]   ;;  %s515_s5 = inlined_call_operand.vmem [shape: f32[8,128], index: 5, kind: output, shape index: {}]  }
   0x1   :  { %264 = vmatprep.subr.mxu0 %v336_v0  ;;  %v42_v1 = vld [vmem:[%s510_s1 + $0x78] sm:$0xff]  ;;  %v41_v2 = vld [vmem:[%s510_s1 + $0x70] sm:$0xff]  ;;  %296 = vmatprep.mubr.msk.f32.mxu0 %vm337_vm0, %v336_v0  ;;  %v40_v3 = vld [vmem:[%s510_s1 + $0x68] sm:$0xff] }
   0x2   :  { %265 = vmatpush3.msra.mxu0 %v42_v1  ;;  %299 = vmatprep.subr.mxu1 %v336_v0  ;;  %v39_v4 = vld [vmem:[%s510_s1 + $0x60] sm:$0xff]  ;;  %v145_v5 = vld [vmem:[%s511_s3 + $0x78] sm:$0xff]  ;;  %v144_v7 = vld [vmem:[%s511_s3 + $0x70] sm:$0xff] }
   0x3   :  { %266 = vmatprep.subr.mxu0 %v336_v0  ;;  %331 = vmatprep.mubr.msk.f32.mxu1 %vm337_vm0, %v336_v0  ;;  %v38_v6 = vld [vmem:[%s510_s1 + $0x58] sm:$0xff]  ;;  %v143_v8 = vld [vmem:[%s511_s3 + $0x68] sm:$0xff]  ;;  %v37_v9 = vld [vmem:[%s510_s1 + $0x50] sm:$0xff] }
   0x4   :  { %267 = vmatpush3.msra.mxu0 %v41_v2  ;;  %300 = vmatpush3.msra.mxu1 %v145_v5  ;;  %v142_v10 = vld [vmem:[%s511_s3 + $0x60] sm:$0xff]  ;;  %v36_v11 = vld [vmem:[%s510_s1 + $0x48] sm:$0xff]  ;;  %v141_v12 = vld [vmem:[%s511_s3 + $0x58] sm:$0xff] }
   0x5   :  { %268 = vmatprep.subr.mxu0 %v336_v0  ;;  %301 = vmatprep.subr.mxu1 %v336_v0  ;;  %v35_v13 = vld [vmem:[%s510_s1 + $0x40] sm:$0xff]  ;;  %v140_v14 = vld [vmem:[%s511_s3 + $0x50] sm:$0xff]  ;;  %v34_v15 = vld [vmem:[%s510_s1 + $0x38] sm:$0xff] }
   0x6   :  { %269 = vmatpush3.msra.mxu0 %v40_v3  ;;  %302 = vmatpush3.msra.mxu1 %v144_v7  ;;  %v139_v16 = vld [vmem:[%s511_s3 + $0x48] sm:$0xff]  ;;  %v33_v17 = vld [vmem:[%s510_s1 + $0x30] sm:$0xff]  ;;  %v138_v18 = vld [vmem:[%s511_s3 + $0x40] sm:$0xff] }
   0x7   :  { %270 = vmatprep.subr.mxu0 %v336_v0  ;;  %303 = vmatprep.subr.mxu1 %v336_v0  ;;  %v32_v19 = vld [vmem:[%s510_s1 + $0x28] sm:$0xff]  ;;  %v137_v20 = vld [vmem:[%s511_s3 + $0x38] sm:$0xff]  ;;  %v31_v21 = vld [vmem:[%s510_s1 + $0x20] sm:$0xff] }
   0x8   :  { %271 = vmatpush3.msra.mxu0 %v39_v4  ;;  %304 = vmatpush3.msra.mxu1 %v143_v8  ;;  %v136_v22 = vld [vmem:[%s511_s3 + $0x30] sm:$0xff]  ;;  %v30_v23 = vld [vmem:[%s510_s1 + $0x18] sm:$0xff]  ;;  %v135_v24 = vld [vmem:[%s511_s3 + $0x28] sm:$0xff] }
   0x9   :  { %272 = vmatprep.subr.mxu0 %v336_v0  ;;  %305 = vmatprep.subr.mxu1 %v336_v0  ;;  %v29_v25 = vld [vmem:[%s510_s1 + $0x10] sm:$0xff]  ;;  %v134_v26 = vld [vmem:[%s511_s3 + $0x20] sm:$0xff]  ;;  %v28_v27 = vld [vmem:[%s510_s1 + $0x8] sm:$0xff] }
   0xa   :  { %273 = vmatpush3.msra.mxu0 %v38_v6  ;;  %306 = vmatpush3.msra.mxu1 %v142_v10  ;;  %v133_v28 = vld [vmem:[%s511_s3 + $0x18] sm:$0xff]  ;;  %v27_v29 = vld [vmem:[%s510_s1] sm:$0xff]  ;;  %v132_v31 = vld [vmem:[%s511_s3 + $0x10] sm:$0xff] }
   0xb   :  { %274 = vmatprep.subr.mxu0 %v336_v0  ;;  %307 = vmatprep.subr.mxu1 %v336_v0  ;;  %v26_v30 = vld [vmem:[%s512_s0] sm:$0xff]  ;;  %v131_v32 = vld [vmem:[%s511_s3 + $0x8] sm:$0xff] }
   0xc   :  { %275 = vmatpush3.msra.mxu0 %v37_v9  ;;  %308 = vmatpush3.msra.mxu1 %v141_v12  ;;  %v130_v33 = vld [vmem:[%s511_s3] sm:$0xff] }
   0xd   :  { %276 = vmatprep.subr.mxu0 %v336_v0  ;;  %309 = vmatprep.subr.mxu1 %v336_v0  ;;  %v228_v34 = vld [vmem:[%s513_s2] ss:$0 sm:$0xff] }
   0xe   :  { %277 = vmatpush3.msra.mxu0 %v36_v11  ;;  %310 = vmatpush3.msra.mxu1 %v140_v14  ;;  %v229_v40 = vld [vmem:[%s514_s4] ss:$0 sm:$0xff] }
   0xf   :  { %278 = vmatprep.subr.mxu0 %v336_v0  ;;  %311 = vmatprep.subr.mxu1 %v336_v0 }
  0x10   :  { %279 = vmatpush3.msra.mxu0 %v35_v13  ;;  %312 = vmatpush3.msra.mxu1 %v139_v16 }
  0x11   :  { %280 = vmatprep.subr.mxu0 %v336_v0  ;;  %313 = vmatprep.subr.mxu1 %v336_v0 }
  0x12   :  { %281 = vmatpush3.msra.mxu0 %v34_v15  ;;  %314 = vmatpush3.msra.mxu1 %v138_v18 }
  0x13   :  { %282 = vmatprep.subr.mxu0 %v336_v0  ;;  %315 = vmatprep.subr.mxu1 %v336_v0 }
  0x14   :  { %283 = vmatpush3.msra.mxu0 %v33_v17  ;;  %316 = vmatpush3.msra.mxu1 %v137_v20 }
  0x15   :  { %284 = vmatprep.subr.mxu0 %v336_v0  ;;  %317 = vmatprep.subr.mxu1 %v336_v0 }
  0x16   :  { %285 = vmatpush3.msra.mxu0 %v32_v19  ;;  %318 = vmatpush3.msra.mxu1 %v136_v22 }
  0x17   :  { %286 = vmatprep.subr.mxu0 %v336_v0  ;;  %319 = vmatprep.subr.mxu1 %v336_v0 }
  0x18   :  { %287 = vmatpush3.msra.mxu0 %v31_v21  ;;  %320 = vmatpush3.msra.mxu1 %v135_v24 }
  0x19   :  { %288 = vmatprep.subr.mxu0 %v336_v0  ;;  %321 = vmatprep.subr.mxu1 %v336_v0 }
  0x1a   :  { %289 = vmatpush3.msra.mxu0 %v30_v23  ;;  %322 = vmatpush3.msra.mxu1 %v134_v26 }
  0x1b   :  { %290 = vmatprep.subr.mxu0 %v336_v0  ;;  %323 = vmatprep.subr.mxu1 %v336_v0 }
  0x1c   :  { %291 = vmatpush3.msra.mxu0 %v29_v25  ;;  %324 = vmatpush3.msra.mxu1 %v133_v28 }
  0x1d   :  { %292 = vmatprep.subr.mxu0 %v336_v0  ;;  %325 = vmatprep.subr.mxu1 %v336_v0 }
  0x1e   :  { %293 = vmatpush3.msra.mxu0 %v28_v27  ;;  %326 = vmatpush3.msra.mxu1 %v132_v31 }
  0x1f   :  { %294 = vmatprep.subr.mxu0 %v336_v0  ;;  %327 = vmatprep.subr.mxu1 %v336_v0 }
  0x20   :  { %295 = vmatpush3.msra.mxu0 %v27_v29  ;;  %328 = vmatpush3.msra.mxu1 %v131_v32 }
  0x21   :  { %297 = vmatmul.mubr.f32.vlgmr.msra.gmra.mxu0 %v26_v30  ;;  %329 = vmatprep.subr.mxu1 %v336_v0 }
  0x22   :  { %330 = vmatpush3.msra.mxu1 %v130_v33 }
  0xe1   :  { %v109_v35 = vpop.f32.mrf.mxu0 }
  0xe2   :  { %v126_v36 = vadd.f32 %v228_v34, %v109_v35 }
  0xe3   :  { %v298_v37 = vpop.f32.mrf.mxu0 }
  0xe4   :  { %v128_v38 = vmul.f32 0.01, %v126_v36  ;;  %vm127_vm1 = vcmp.gt.f32.partialorder %v126_v36, 0.0 }
  0xe6   :  { %v129_v39 = vsel %vm127_vm1, %v126_v36, %v128_v38 }
  0xe7   :  { %332 = vmatmul.mubr.f32.vlgmr.msra.gmra.mxu1 %v129_v39 }
 0x1a7   :  { %v219_v41 = vpop.f32.mrf.mxu1 }
 0x1a8   :  { %v220_v42 = vadd.f32 %v229_v40, %v219_v41 }
 0x1a9   :  { %v333_v43 = vpop.f32.mrf.mxu1 }
 0x1aa   :  { %223 = vst [vmem:[%s515_s5] sm:$0xff] %v220_v42 }

</bundles_post_ra>
